<compile_context>
chip_gen: v5e
topology: v5e:2x2
jax: 0.10.0
libtpu: 0.0.40
codegen_flags: <defaults>
</compile_context>

<pallas_src>
import jax
import jax.numpy as jnp
from jax.experimental import pallas as pl
from jax.experimental.pallas import tpu as pltpu

NUM_STOPS = 100
EMB_DIM = 32
HIDDEN_DIM = 64
OUT_DIM = 100

NUM_STOPS_PAD = 128   # lane-aligned padded vocabulary (matmul contraction dim)

ROW_PACK = 8          # indices packed 8 per row -> dense index DMA / VMEM
TB_ALIGN = 64         # tile alignment: ROW_PACK * 8 sublanes of packed indices
TB_DEFAULT = 2048     # batch-tile rows (sweepable); bounded VMEM for any B


def _round_up(x, m):
    return (x + m - 1) // m * m


def _choose_tile(batch):
    """Pick the batch tile: large enough to amortize per-step overhead, but
    capped so large batches keep grid >= 2 (v7x megacore sharding)."""
    half = _round_up(pl.cdiv(batch, 2), TB_ALIGN)
    return min(TB_DEFAULT, max(half, TB_ALIGN))


def prepare_params(params):
    """One-time fold of the whole eval-mode network into a lookup table.

    Exact: the only input is an index in [0, NUM_STOPS) and dropout is the
    identity in eval mode, so out = T_full[idx].
    Returns the table zero-padded to (NUM_STOPS_PAD, OUT_DIM) float32.
    """
    emb_table, w1, b1, w2, b2, w3, b3 = params
    h = jnp.maximum(emb_table @ w1 + b1, 0.0)       # (NUM_STOPS, HIDDEN)
    h = jnp.maximum(h @ w2 + b2, 0.0)               # (NUM_STOPS, HIDDEN)
    t_full = h @ w3 + b3                            # (NUM_STOPS, OUT_DIM)
    t_pad = (
        jnp.zeros((NUM_STOPS_PAD, OUT_DIM), jnp.float32)
        .at[:NUM_STOPS, :]
        .set(t_full)
    )
    return t_pad


def dqn_kernel(idx_ref, table_ref, o_ref):
    """One batch tile: one-hot gather of the fully-folded network table via a
    single MXU matmul. Padded vocab rows are never selected (idx < NUM_STOPS);
    padded batch rows reuse index 0 and are discarded by the wrapper."""
    idx = idx_ref[...]                                   # (tb/8, 8) int32
    rows, pack = idx.shape
    stops = jax.lax.broadcasted_iota(jnp.int32, (rows, pack, NUM_STOPS_PAD), 2)
    onehot = (stops == idx[..., None]).astype(jnp.float32)
    onehot = onehot.reshape(rows * pack, NUM_STOPS_PAD)  # (tb, 128), layout-preserving
    o_ref[...] = jnp.dot(
        onehot, table_ref[...], preferred_element_type=jnp.float32
    )


def dqn_forward(idx, table_pad):
    """idx: int32 array of arbitrary leading shape, values in [0, NUM_STOPS).
    table_pad: output of prepare_params().
    Returns float32 array of shape idx.shape + (OUT_DIM,)."""
    lead_shape = idx.shape
    flat_idx = idx.reshape(-1).astype(jnp.int32)
    B = flat_idx.shape[0]

    tb = _choose_tile(B)
    B_pad = _round_up(B, tb)

    # Pack 8 indices per row so the index block is lane/DMA dense.
    idx_p = (
        jnp.zeros((B_pad,), jnp.int32)
        .at[:B]
        .set(flat_idx)
        .reshape(B_pad // ROW_PACK, ROW_PACK)
    )

    grid = (B_pad // tb,)

    flops = 2 * B_pad * NUM_STOPS_PAD * OUT_DIM
    bytes_accessed = (
        B_pad * 4                       # index stream in
        + B_pad * OUT_DIM * 4           # output stream out
        + NUM_STOPS_PAD * OUT_DIM * 4   # resident table
    )

    out = pl.pallas_call(
        dqn_kernel,
        out_shape=jax.ShapeDtypeStruct((B_pad, OUT_DIM), jnp.float32),
        grid=grid,
        in_specs=[
            # packed index tile: (tb/8, 8); last dim equals full array last dim
            pl.BlockSpec((tb // ROW_PACK, ROW_PACK), lambda i: (i, 0)),
            # fully-folded network table, resident across the grid
            pl.BlockSpec((NUM_STOPS_PAD, OUT_DIM), lambda i: (0, 0)),
        ],
        # OUT_DIM=100 equals the full last dim -> legal block; no padded lanes
        # are written to HBM and no wrapper re-slice of the lane axis is needed.
        out_specs=pl.BlockSpec((tb, OUT_DIM), lambda i: (i, 0)),
        compiler_params=pltpu.CompilerParams(
            dimension_semantics=("parallel",),
        ),
        cost_estimate=pl.CostEstimate(
            flops=flops, transcendentals=0, bytes_accessed=bytes_accessed
        ),
    )(idx_p, table_pad)

    return out[:B].reshape(lead_shape + (OUT_DIM,))


def init_params(key):
    """Deterministic parameter init matching the PyTorch module's shapes.
    PyTorch stores Linear weights as (out, in); we keep (in, out) for x @ W."""
    k_emb, k1, k1b, k2, k2b, k3, k3b = jax.random.split(key, 7)

    emb_table = jax.random.normal(k_emb, (NUM_STOPS, EMB_DIM), jnp.float32)

    def linear(kw, kb, fan_in, fan_out):
        bound = 1.0 / jnp.sqrt(jnp.float32(fan_in))
        w = jax.random.uniform(kw, (fan_in, fan_out), jnp.float32, -bound, bound)
        b = jax.random.uniform(kb, (1, fan_out), jnp.float32, -bound, bound)
        return w, b

    w1, b1 = linear(k1, k1b, EMB_DIM, HIDDEN_DIM)
    w2, b2 = linear(k2, k2b, HIDDEN_DIM, HIDDEN_DIM)
    w3, b3 = linear(k3, k3b, HIDDEN_DIM, OUT_DIM)
    return (emb_table, w1, b1, w2, b2, w3, b3)


if __name__ == "__main__":
    key = jax.random.PRNGKey(0)
    k_params, k_idx = jax.random.split(key)

    params = init_params(k_params)
    # One-time prep, hoisted out of the hot path.
    table_pad = jax.block_until_ready(prepare_params(params))

    # Small example: batch=2, seq=8 integer stop indices.
    x = jax.random.randint(k_idx, (2, 8), 0, NUM_STOPS, dtype=jnp.int32)

    out = dqn_forward(x, table_pad)
    out = jax.block_until_ready(out)

    # Sanity check against a pure-JAX reference (original, un-fused math).
    emb_table, w1, b1, w2, b2, w3, b3 = params
    ref = jnp.take(emb_table, x.reshape(-1), axis=0)
    ref = jnp.maximum(ref @ w1 + b1, 0.0)
    ref = jnp.maximum(ref @ w2 + b2, 0.0)
    ref = (ref @ w3 + b3).reshape(2, 8, OUT_DIM)

    assert out.shape == (2, 8, OUT_DIM), out.shape
    assert jnp.allclose(out, ref, atol=1e-4, rtol=1e-4), float(
        jnp.max(jnp.abs(out - ref))
    )

    print("KERNEL_OK")
</pallas_src>

<mosaic_0001>
module attributes {stable_mosaic.version = 11 : i64} {
  func.func @dqn_kernel(%arg0: i32, %arg1: memref<8x8xi32, #tpu.memory_space<vmem>>, %arg2: memref<128x100xf32, #tpu.memory_space<vmem>>, %arg3: memref<64x100xf32, #tpu.memory_space<vmem>>) attributes {dimension_semantics = [#tpu.dimension_semantics<parallel>], iteration_bounds = array<i64: 1>, scalar_prefetch = 0 : i64, scratch_operands = 0 : i64, tpu.core_type = #tpu.core_type<tc>, window_params = [{transform_indices = @transform_0, window_bounds = array<i64: 8, 8>}, {pipeline_mode = #tpu.pipeline_mode<synchronous>, transform_indices = @transform_1, window_bounds = array<i64: 128, 100>}, {transform_indices = @transform_2, window_bounds = array<i64: 64, 100>}]} {
    %c0 = arith.constant 0 : index
    %c0_0 = arith.constant 0 : index
    %0 = vector.load %arg1[%c0, %c0_0] : memref<8x8xi32, #tpu.memory_space<vmem>>, vector<8x8xi32>
    %1 = tpu.iota {dimensions = array<i32: 2>} : vector<8x8x128xi32>
    %2 = vector.shape_cast %0 : vector<8x8xi32> to vector<8x8x1xi32>
    %3 = vector.broadcast %2 : vector<8x8x1xi32> to vector<8x8x128xi32>
    %4 = arith.cmpi eq, %1, %3 : vector<8x8x128xi32>
    %5 = arith.extui %4 : vector<8x8x128xi1> to vector<8x8x128xi32>
    %6 = arith.sitofp %5 : vector<8x8x128xi32> to vector<8x8x128xf32>
    %7 = vector.shape_cast %6 : vector<8x8x128xf32> to vector<64x128xf32>
    %c0_1 = arith.constant 0 : index
    %c0_2 = arith.constant 0 : index
    %8 = vector.load %arg2[%c0_1, %c0_2] : memref<128x100xf32, #tpu.memory_space<vmem>>, vector<128x100xf32>
    %cst = arith.constant dense<0.000000e+00> : vector<64x100xf32>
    %9 = tpu.matmul %7, %8, %cst {dimension_numbers = #tpu.dot_dimension_numbers<[1], [0], [0], [1], [0, 0, 1, 1], [], []>} : vector<64x128xf32>, vector<128x100xf32>, vector<64x100xf32> -> vector<64x100xf32>
    %c0_3 = arith.constant 0 : index
    %c0_4 = arith.constant 0 : index
    %10 = vector.load %arg3[%c0_3, %c0_4] : memref<64x100xf32, #tpu.memory_space<vmem>>, vector<64x100xf32>
    tpu.vector_store %arg3[%c0_3, %c0_4], %9 {strides = array<i32>} : memref<64x100xf32, #tpu.memory_space<vmem>>, vector<64x100xf32>,
    return
  }
  func.func @transform_0(%arg0: i32) -> (i32, i32) {
    %c0_i32 = arith.constant 0 : i32
    %c0_i32_0 = arith.constant 0 : i32
    return %arg0, %c0_i32 : i32, i32
  }
  func.func @transform_1(%arg0: i32) -> (i32, i32) {
    %c0_i32 = arith.constant 0 : i32
    %c0_i32_0 = arith.constant 0 : i32
    %c0_i32_1 = arith.constant 0 : i32
    return %c0_i32, %c0_i32_0 : i32, i32
  }
  func.func @transform_2(%arg0: i32) -> (i32, i32) {
    %c0_i32 = arith.constant 0 : i32
    %c0_i32_0 = arith.constant 0 : i32
    return %arg0, %c0_i32 : i32, i32
  }
}

</mosaic_0001>

<bundles_post_ra>
// kernel: tpu_custom_call.1
= control target key start
LH: loop header
LB: loop body
LE: loop exit
PB: predicated region body
PF: predicated region fallthrough
CT: control target
= control target key end

     0   :  { %v13_v0 = vlaneseq  ;;  %s369_s0 = inlined_call_operand.vmem [shape: s32[8,8], index: 0, kind: input, shape index: {}]   ;;  %s370_s1 = inlined_call_operand.vmem [shape: f32[128,100], index: 1, kind: input, shape index: {}]   ;;  %s371_s2 = inlined_call_operand.hbm [shape: f32[64,100], index: 2, kind: output, shape index: {}]  }
   0x1   :  { %v110_v1 = vld [vmem:[%s370_s1 + $0x78] sm:$0xff]  ;;  %v109_v2 = vld [vmem:[%s370_s1 + $0x70] sm:$0xff]  ;;  %v108_v4 = vld [vmem:[%s370_s1 + $0x68] sm:$0xff] }
   0x2   :  { %196 = vmatpush.msra.mxu2 %v110_v1  ;;  %111 = vmatpush.msra.mxu0 %v110_v1  ;;  %v17_v3 = vshrl.u32 %v13_v0, 7  ;;  %v107_v5 = vld [vmem:[%s370_s1 + $0x60] sm:$0xff]  ;;  %v106_v7 = vld [vmem:[%s370_s1 + $0x58] sm:$0xff] }
   0x3   :  { %195 = vmatpush.msra.mxu1 %v110_v1  ;;  %197 = vmatpush.msra.mxu3 %v110_v1  ;;  %v311_v6 = vld [vmem:[%s369_s0] sm:$0xff] }
   0x4   :  { %199 = vmatpush.msra.mxu2 %v109_v2  ;;  %112 = vmatpush.msra.mxu0 %v109_v2 }
   0x5   :  { %248 = vset.pattern.permute.xlu1 %v17_v3  ;;  %247 = vset.pattern.permute.xlu0 %v17_v3 }
   0x6   :  { %249 = vset.pattern.permute.xlu2 %v17_v3  ;;  %202 = vmatpush.msra.mxu2 %v108_v4 }
   0x7   :  { %198 = vmatpush.msra.mxu1 %v109_v2  ;;  %200 = vmatpush.msra.mxu3 %v109_v2 }
   0x8   :  { %7 = vsyncpa [#allocation3], 0  ;;  %205 = vmatpush.msra.mxu2 %v107_v5  ;;  %113 = vmatpush.msra.mxu0 %v108_v4  ;;  %v43_v8 = vperm.slane %v311_v6, 4  ;;  %v15_v9 = vperm.slane %v311_v6, 0  ;;  %v105_v10 = vld [vmem:[%s370_s1 + $0x50] sm:$0xff]  ;;  %v50_v11 = vperm.slane %v311_v6, 5 }
   0x9   :  { %201 = vmatpush.msra.mxu1 %v108_v4  ;;  %203 = vmatpush.msra.mxu3 %v108_v4  ;;  %v104_v12 = vld [vmem:[%s370_s1 + $0x48] sm:$0xff]  ;;  %v103_v13 = vld [vmem:[%s370_s1 + $0x40] sm:$0xff]  ;;  %v102_v14 = vld [vmem:[%s370_s1 + $0x38] sm:$0xff]  ;;  %v57_v15 = vperm.slane %v311_v6, 6  ;;  %v29_v16 = vperm.slane %v311_v6, 2  ;;  %v64_v18 = vperm.slane %v311_v6, 7 }
   0xa   :  { %208 = vmatpush.msra.mxu2 %v106_v7  ;;  %114 = vmatpush.msra.mxu0 %v107_v5  ;;  %v101_v17 = vld [vmem:[%s370_s1 + $0x30] sm:$0xff]  ;;  %v100_v19 = vld [vmem:[%s370_s1 + $0x28] sm:$0xff]  ;;  %v99_v20 = vld [vmem:[%s370_s1 + $0x20] sm:$0xff]  ;;  %v22_v22 = vperm.slane %v311_v6, 1  ;;  %v36_v23 = vperm.slane %v311_v6, 3  ;;  %v14_v27 = vand.u32 127, %v13_v0 }
   0xb   :  { %204 = vmatpush.msra.mxu1 %v107_v5  ;;  %206 = vmatpush.msra.mxu3 %v107_v5  ;;  %v98_v21 = vld [vmem:[%s370_s1 + $0x18] sm:$0xff]  ;;  %v97_v24 = vld [vmem:[%s370_s1 + $0x10] sm:$0xff]  ;;  %v96_v25 = vld [vmem:[%s370_s1 + $0x8] sm:$0xff]  ;;  %v276_v30 = vmov 1.0   ;;  %vm152_vm8 = vcmask 818176   ;;  %s167_s17 = sshll.u32 %s371_s2, 4  ;;  %s168_s17 = int_to_ptr.hbm [resolvable:$true] %s167_s17 }
   0xc   :  { %211 = vmatpush.msra.mxu2 %v105_v10  ;;  %115 = vmatpush.msra.mxu0 %v106_v7  ;;  %v95_v26 = vld [vmem:[%s370_s1] sm:$0xff]  ;;  %s277_s1 = smov [#allocation2]   ;;  %s278_s18 = smov 128  }
   0xd   :  { %48 = vperm.xlu0 %247, %v43_v8   ;;  %20 = vperm.xlu1 %248, %v15_v9   ;;  %s165_s14 = sshll.u32 %s277_s1, 4  ;;  %s279_s19 = smov 8   ;;  %s166_s14 = int_to_ptr.vmem [resolvable:$true] %s165_s14 }
   0xe   :  { %55 = vperm.xlu2 %249, %v50_v11   ;;  %214 = vmatpush.msra.mxu2 %v104_v12 }
   0xf   :  { %207 = vmatpush.msra.mxu1 %v106_v7  ;;  %209 = vmatpush.msra.mxu3 %v106_v7 }
  0x10   :  { %217 = vmatpush.msra.mxu2 %v103_v13  ;;  %116 = vmatpush.msra.mxu0 %v105_v10 }
  0x11   :  { %210 = vmatpush.msra.mxu1 %v105_v10  ;;  %212 = vmatpush.msra.mxu3 %v105_v10 }
  0x12   :  { %220 = vmatpush.msra.mxu2 %v102_v14  ;;  %117 = vmatpush.msra.mxu0 %v104_v12 }
  0x13   :  { %213 = vmatpush.msra.mxu1 %v104_v12  ;;  %215 = vmatpush.msra.mxu3 %v104_v12 }
  0x14   :  { %223 = vmatpush.msra.mxu2 %v101_v17  ;;  %118 = vmatpush.msra.mxu0 %v103_v13 }
  0x15   :  { %62 = vperm.xlu0 %247, %v57_v15   ;;  %34 = vperm.xlu1 %248, %v29_v16  }
  0x16   :  { %69 = vperm.xlu2 %249, %v64_v18   ;;  %226 = vmatpush.msra.mxu2 %v100_v19 }
  0x17   :  { %216 = vmatpush.msra.mxu1 %v103_v13  ;;  %218 = vmatpush.msra.mxu3 %v103_v13 }
  0x18   :  { %119 = vmatpush.msra.mxu0 %v102_v14  ;;  %229 = vmatpush.msra.mxu2 %v99_v20 }
  0x19   :  { %219 = vmatpush.msra.mxu1 %v102_v14  ;;  %221 = vmatpush.msra.mxu3 %v102_v14 }
  0x1a   :  { %120 = vmatpush.msra.mxu0 %v101_v17  ;;  %232 = vmatpush.msra.mxu2 %v98_v21 }
  0x1b   :  { %222 = vmatpush.msra.mxu1 %v101_v17  ;;  %224 = vmatpush.msra.mxu3 %v101_v17 }
  0x1c   :  { %121 = vmatpush.msra.mxu0 %v100_v19  ;;  %235 = vmatpush.msra.mxu2 %v97_v24 }
  0x1d   :  { %27 = vperm.xlu0 %247, %v22_v22   ;;  %41 = vperm.xlu1 %248, %v36_v23  }
  0x1e   :  { %225 = vmatpush.msra.mxu1 %v100_v19  ;;  %227 = vmatpush.msra.mxu3 %v100_v19 }
  0x1f   :  { %122 = vmatpush.msra.mxu0 %v99_v20  ;;  %238 = vmatpush.msra.mxu2 %v96_v25 }
  0x20   :  { %228 = vmatpush.msra.mxu1 %v99_v20  ;;  %230 = vmatpush.msra.mxu3 %v99_v20 }
  0x21   :  { %123 = vmatpush.msra.mxu0 %v98_v21  ;;  %241 = vmatpush.msra.mxu2 %v95_v26 }
  0x22   :  { %231 = vmatpush.msra.mxu1 %v98_v21  ;;  %233 = vmatpush.msra.mxu3 %v98_v21 }
  0x23   :  { %124 = vmatpush.msra.mxu0 %v97_v24 }
  0x24   :  { %234 = vmatpush.msra.mxu1 %v97_v24  ;;  %236 = vmatpush.msra.mxu3 %v97_v24 }
  0x25   :  { %125 = vmatpush.msra.mxu0 %v96_v25 }
  0x26   :  { %237 = vmatpush.msra.mxu1 %v96_v25  ;;  %239 = vmatpush.msra.mxu3 %v96_v25 }
  0x27   :  { %126 = vmatpush.msra.mxu0 %v95_v26 }
  0x28   :  { %240 = vmatpush.msra.mxu1 %v95_v26  ;;  %242 = vmatpush.msra.mxu3 %v95_v26 }
  0x68   :  { %v56_v31 = vpop.permute.xlu2 %55 }
  0x69   :  { %vm76_vm2 = vcmp.eq.s32.totalorder %v14_v27, %v56_v31 }
  0x70   :  { %v70_v34 = vpop.permute.xlu2 %69 }
  0x71   :  { %vm78_vm7 = vcmp.eq.s32.totalorder %v14_v27, %v70_v34 }
  0x7f   :  { %v49_v28 = vpop.permute.xlu0 %48  ;;  %v21_v29 = vpop.permute.xlu1 %20 }
  0x80   :  { %vm75_vm0 = vcmp.eq.s32.totalorder %v14_v27, %v49_v28  ;;  %vm71_vm1 = vcmp.eq.s32.totalorder %v14_v27, %v21_v29 }
  0x81   :  { %191 = vmatmul.msk.f32.vlgmr.msra.gmra.mxu2 %vm75_vm0, %v276_v30  ;;  %187 = vmatmul.msk.f32.vlgmr.msra.gmra.mxu0 %vm71_vm1, %v276_v30 }
  0x87   :  { %v63_v32 = vpop.permute.xlu0 %62  ;;  %v35_v33 = vpop.permute.xlu1 %34 }
  0x88   :  { %vm77_vm3 = vcmp.eq.s32.totalorder %v14_v27, %v63_v32  ;;  %vm73_vm4 = vcmp.eq.s32.totalorder %v14_v27, %v35_v33 }
  0x89   :  { %189 = vmatmul.msk.f32.vlgmr.msra.gmra.mxu1 %vm73_vm4, %v276_v30  ;;  %192 = vmatmul.msk.f32.gmra.mxu2 %vm76_vm2, %v276_v30 }
  0x8a   :  { %193 = vmatmul.msk.f32.vlgmr.msra.gmra.mxu3 %vm77_vm3, %v276_v30 }
  0x8f   :  { %v28_v35 = vpop.permute.xlu0 %27  ;;  %v42_v36 = vpop.permute.xlu1 %41 }
  0x90   :  { %vm72_vm5 = vcmp.eq.s32.totalorder %v14_v27, %v28_v35  ;;  %vm74_vm6 = vcmp.eq.s32.totalorder %v14_v27, %v42_v36 }
  0x91   :  { %188 = vmatmul.msk.f32.gmra.mxu0 %vm72_vm5, %v276_v30  ;;  %190 = vmatmul.msk.f32.gmra.mxu1 %vm74_vm6, %v276_v30 }
  0x92   :  { %194 = vmatmul.msk.f32.gmra.mxu3 %vm78_vm7, %v276_v30 }
  0xfe   :  { %v128_v37 = vpop.f32.mrf.mxu0 }
  0xff   :  { %153 = vst.msk [vmem:[#allocation2] sm:$0xff] %vm152_vm8, %v128_v37 }
 0x104   :  { %v140_v38 = vpop.f32.mrf.mxu2 }
 0x105   :  { %157 = vst.msk [vmem:[#allocation2 + $0x20] sm:$0xff] %vm152_vm8, %v140_v38 }
 0x106   :  { %v134_v39 = vpop.f32.mrf.mxu1 }
 0x107   :  { %155 = vst.msk [vmem:[#allocation2 + $0x10] sm:$0xff] %vm152_vm8, %v134_v39 }
 0x10c   :  { %v143_v40 = vpop.f32.mrf.mxu2 }
 0x10d   :  { %158 = vst.msk [vmem:[#allocation2 + $0x28] sm:$0xff] %vm152_vm8, %v143_v40  ;;  %v146_v41 = vpop.f32.mrf.mxu3 }
 0x10e   :  { %159 = vst.msk [vmem:[#allocation2 + $0x30] sm:$0xff] %vm152_vm8, %v146_v41  ;;  %v131_v42 = vpop.f32.mrf.mxu0  ;;  %v137_v43 = vpop.f32.mrf.mxu1 }
 0x10f   :  { %154 = vst.msk [vmem:[#allocation2 + $0x8] sm:$0xff] %vm152_vm8, %v131_v42 }
 0x110   :  { %156 = vst.msk [vmem:[#allocation2 + $0x18] sm:$0xff] %vm152_vm8, %v137_v43 }
 0x115   :  { %v149_v44 = vpop.f32.mrf.mxu3 }
 0x116   :  { %160 = vst.msk [vmem:[#allocation2 + $0x38] sm:$0xff] %vm152_vm8, %v149_v44 }
 0x117   :  { %173 = dma.vmem_to_hbm [thread:$0]  %s166_s14, 1024, %s168_s17, [#allocation3], %s278_s18, %s278_s18, %s279_s19  }
 0x118   :  { %274 = dma.done.wait [#allocation3], 1024  }
 0x119   :  { %275 = vsyncadd [#allocation3], 4294966272 }
 0x11a   :  { %178 = vsyncpa [#allocation3], 1 }

</bundles_post_ra>
